<compile_context>
chip_gen: v7x
topology: tpu7x:2x2x1
jax: 0.10.0
libtpu: 0.0.40
codegen_flags: <defaults>
</compile_context>

<pallas_src>
import numpy as np
import jax
import jax.numpy as jnp
from jax.experimental import pallas as pl
from jax.experimental.pallas import tpu as pltpu

MANIFOLD_DIM = 16
HIDDEN_DIM = 32
BATCH = 8
STABILITY_EPS = 1e-6  # the 1e-6 * I regularizer used inside compute_metric

# ---- packed parameter slab layout (f32, lane/sublane aligned blocks) -------
#   rows [0, M)   cols [COL_L1,  COL_L1 + 2H)    : [w1 | wm1]        (16,  64)
#   rows [0, H)   cols [COL_L2,  COL_L2 + M+H)   : [w2 | w2 @ wm1]   (32,  48)
#   rows [0, H)   cols [COL_MET, COL_MET + M*M)  : wm2 symmetrized   (32, 256)
#   row  BIAS_ROW, same column ranges            : packed biases
#     [b1 | bm1], [b2 | b2@wm1 + bm1], [sym(bm2) + eps*vec(I)]
COL_L1 = 0
COL_L2 = 128
COL_MET = 256
BIAS_ROW = 32
SLAB_ROWS = 40   # >= BIAS_ROW + 1, multiple of 8
SLAB_COLS = 512  # = COL_MET + M*M, multiple of 128


def base_flow_kernel(x_ref, slab_ref, out_ref):
    m, h = MANIFOLD_DIM, HIDDEN_DIM
    b = x_ref.shape[0]

    x = x_ref[...]                                                  # (B, M) f32

    # --- fused first layer: x @ [w1 | wm1] -------------------------------
    wcat = slab_ref[0:m, COL_L1:COL_L1 + 2 * h]                     # (M, 2H)
    bcat = slab_ref[BIAS_ROW:BIAS_ROW + 1, COL_L1:COL_L1 + 2 * h]   # (1, 2H)
    hcat = jnp.tanh(
        jnp.dot(x, wcat, preferred_element_type=jnp.float32) + bcat)  # (B, 2H)
    h_flow = hcat[:, 0:h]                                           # (B, H)
    hm_x = hcat[:, h:2 * h]                                         # (B, H)

    # --- fused second layer: h_flow @ [w2 | w2@wm1] -----------------------
    # Columns [0:M) are `current`; columns [M:M+H) are the pre-tanh hidden of
    # the metric net evaluated at `current` (host-side fold, see prepare).
    w2cat = slab_ref[0:h, COL_L2:COL_L2 + m + h]                    # (H, M+H)
    b2cat = slab_ref[BIAS_ROW:BIAS_ROW + 1, COL_L2:COL_L2 + m + h]  # (1, M+H)
    o2 = jnp.dot(h_flow, w2cat, preferred_element_type=jnp.float32) + b2cat
    cur = o2[:, 0:m]                                                # (B, M)
    hm_cur = jnp.tanh(o2[:, m:m + h])                               # (B, H)

    # --- metric final layer (pre-symmetrized, eps*I folded into bias) -----
    wm2s = slab_ref[0:h, COL_MET:COL_MET + m * m]                   # (H, M*M)
    bm2s = slab_ref[BIAS_ROW:BIAS_ROW + 1, COL_MET:COL_MET + m * m]  # (1, M*M)
    mx = jnp.dot(hm_x, wm2s, preferred_element_type=jnp.float32) + bm2s   # (B, M*M)
    mc = jnp.dot(hm_cur, wm2s, preferred_element_type=jnp.float32) + bm2s  # (B, M*M)

    # Frobenius norms: lane reduce (XLU) then tiny sublane reduce, per metric.
    n0sq = jnp.sum(jnp.sum(mx * mx, axis=-1, keepdims=True),
                   axis=0, keepdims=True)                           # (1, 1)
    n1sq = jnp.sum(jnp.sum(mc * mc, axis=-1, keepdims=True),
                   axis=0, keepdims=True)                           # (1, 1)

    # --- single merged output tile ----------------------------------------
    out_ref[0:b, :] = cur
    out_ref[b:b + 2, 0:1] = jnp.sqrt(
        jnp.concatenate([n0sq, n1sq], axis=0))                      # (2, 1)


def init_params(key, m=MANIFOLD_DIM, h=HIDDEN_DIM):
    """Deterministic PyTorch-Linear-style init (U(-1/sqrt(fan_in), 1/sqrt(fan_in)))."""
    ks = jax.random.split(key, 8)

    def linear(kw, kb, fan_in, fan_out):
        bound = 1.0 / float(np.sqrt(fan_in))
        w = jax.random.uniform(kw, (fan_in, fan_out), jnp.float32, -bound, bound)
        b = jax.random.uniform(kb, (1, fan_out), jnp.float32, -bound, bound)
        return w, b

    w1, b1 = linear(ks[0], ks[1], m, h)          # flow layer 1
    w2, b2 = linear(ks[2], ks[3], h, m)          # flow layer 2
    wm1, bm1 = linear(ks[4], ks[5], m, h)        # metric_net layer 1
    wm2, bm2 = linear(ks[6], ks[7], h, m * m)    # metric_net layer 2
    return dict(w1=w1, b1=b1, w2=w2, b2=b2, wm1=wm1, bm1=bm1, wm2=wm2, bm2=bm2)


def prepare_params(raw, m=MANIFOLD_DIM, h=HIDDEN_DIM):
    """One-time host preprocessing (NOT in the per-call hot path).

    * Symmetrize the last metric-net layer (linear in the hidden activation).
    * Fold the +1e-6*I regularizer into the symmetrized bias.
    * Fuse w1/wm1 into one (M, 2H) first-layer weight.
    * Fold the metric-net first layer through the flow second layer:
        w2cat = [w2 | w2 @ wm1],  b2cat = [b2 | b2 @ wm1 + bm1]   (all f32).
    * Pack every weight and bias into a single (40, 512) f32 slab whose blocks
      start on 8-sublane / 128-lane boundaries -> one input DMA, zero-cost
      static slices in the kernel.
    """
    w1, b1 = np.asarray(raw["w1"], np.float32), np.asarray(raw["b1"], np.float32)
    w2, b2 = np.asarray(raw["w2"], np.float32), np.asarray(raw["b2"], np.float32)
    wm1, bm1 = np.asarray(raw["wm1"], np.float32), np.asarray(raw["bm1"], np.float32)
    wm2, bm2 = np.asarray(raw["wm2"], np.float32), np.asarray(raw["bm2"], np.float32)

    # sym[b, i*M+j] = 0.5*(M[b,i,j] + M[b,j,i]) is linear in the hidden.
    idx = np.arange(m * m)
    perm = (idx % m) * m + (idx // m)            # flat index of the transpose
    wm2s = 0.5 * (wm2 + wm2[:, perm])
    bm2s = (0.5 * (bm2 + bm2[:, perm])
            + STABILITY_EPS * np.eye(m, dtype=np.float32).reshape(1, m * m))

    # Fold metric-net layer 1 through flow layer 2 (compose in f32).
    w2wm1 = w2 @ wm1                              # (H, H)
    bm1p = b2 @ wm1 + bm1                         # (1, H)

    slab = np.zeros((SLAB_ROWS, SLAB_COLS), np.float32)
    slab[0:m, COL_L1:COL_L1 + 2 * h] = np.concatenate([w1, wm1], axis=1)
    slab[BIAS_ROW, COL_L1:COL_L1 + 2 * h] = np.concatenate([b1, bm1], axis=1)[0]
    slab[0:h, COL_L2:COL_L2 + m + h] = np.concatenate([w2, w2wm1], axis=1)
    slab[BIAS_ROW, COL_L2:COL_L2 + m + h] = np.concatenate([b2, bm1p], axis=1)[0]
    slab[0:h, COL_MET:COL_MET + m * m] = wm2s
    slab[BIAS_ROW, COL_MET:COL_MET + m * m] = bm2s[0]
    return jnp.asarray(slab)


@jax.jit
def base_geometric_flow_forward(x, slab):
    """Pallas implementation of BaseGeometricFlow.forward (return_path=False).

    Returns device arrays: (current (B, M), norms (2,) = [initial, final]).
    """
    b, m = x.shape
    # No grid: whole problem (~90 KB) fits VMEM on all generations; single
    # merged output tile -> one writeback DMA.
    out = pl.pallas_call(
        base_flow_kernel,
        out_shape=jax.ShapeDtypeStruct((b + 2, m), jnp.float32),
        in_specs=[pl.BlockSpec(memory_space=pltpu.MemorySpace.VMEM),
                  pl.BlockSpec(memory_space=pltpu.MemorySpace.VMEM)],
        out_specs=pl.BlockSpec(memory_space=pltpu.MemorySpace.VMEM),
    )(x, slab)
    current = out[0:b, :]
    norms = out[b:b + 2, 0]
    return current, norms


def ref_forward(x, params, m=MANIFOLD_DIM):
    """Pure-JAX f32 reference mirroring the PyTorch forward."""
    def compute_metric(v):
        hm = jnp.tanh(v @ params["wm1"] + params["bm1"])
        mc = hm @ params["wm2"] + params["bm2"]
        met = mc.reshape(v.shape[0], m, m)
        met = 0.5 * (met + jnp.swapaxes(met, -1, -2))
        met = met + jnp.eye(m, dtype=met.dtype) * STABILITY_EPS
        return met

    hh = jnp.tanh(x @ params["w1"] + params["b1"])
    cur = hh @ params["w2"] + params["b2"]
    n0 = jnp.linalg.norm(compute_metric(x))
    n1 = jnp.linalg.norm(compute_metric(cur))
    return cur, float(n0), float(n1)


# TODO(synk): flow_step / compute_ricci_tensor / detect_singularities /
# normalize_flow use torch.linalg.eig (complex eigendecomposition) and are not
# part of forward(); they are intentionally not translated to Pallas.

if __name__ == "__main__":
    key = jax.random.PRNGKey(0)
    k_param, k_x = jax.random.split(key)
    raw_params = init_params(k_param)
    slab = prepare_params(raw_params)            # one-time host preprocessing
    x = jax.random.normal(k_x, (BATCH, MANIFOLD_DIM), jnp.float32)

    current, norms = base_geometric_flow_forward(x, slab)
    jax.block_until_ready((current, norms))

    # Single host transfer for both scalars.
    norms_host = np.asarray(norms)
    metrics = {
        "initial_metric_norm": float(norms_host[0]),
        "final_metric_norm": float(norms_host[1]),
    }

    # Sanity check against pure-JAX f32 reference (tolerance covers default
    # TPU matmul precision in both paths).
    cur_ref, n0_ref, n1_ref = ref_forward(x, raw_params)
    assert current.shape == (BATCH, MANIFOLD_DIM)
    assert np.allclose(np.asarray(current), np.asarray(cur_ref),
                       rtol=2e-2, atol=2e-2)
    assert abs(metrics["initial_metric_norm"] - n0_ref) <= 2e-2 * max(1.0, abs(n0_ref))
    assert abs(metrics["final_metric_norm"] - n1_ref) <= 2e-2 * max(1.0, abs(n1_ref))

    print("KERNEL_OK")
</pallas_src>

<mosaic_0001>
module attributes {stable_mosaic.version = 11 : i64} {
  func.func @base_flow_kernel(%arg0: memref<8x16xf32, #tpu.memory_space<vmem>>, %arg1: memref<40x512xf32, #tpu.memory_space<vmem>>, %arg2: memref<10x16xf32, #tpu.memory_space<vmem>>) attributes {dimension_semantics = [], scalar_prefetch = 0 : i64, scratch_operands = 0 : i64, tpu.core_type = #tpu.core_type<tc>} {
    %c0 = arith.constant 0 : index
    %c0_0 = arith.constant 0 : index
    %0 = vector.load %arg0[%c0, %c0_0] : memref<8x16xf32, #tpu.memory_space<vmem>>, vector<8x16xf32>
    %c0_1 = arith.constant 0 : index
    %c0_2 = arith.constant 0 : index
    %1 = vector.load %arg1[%c0_1, %c0_2] : memref<40x512xf32, #tpu.memory_space<vmem>>, vector<16x64xf32>
    %c32 = arith.constant 32 : index
    %c0_3 = arith.constant 0 : index
    %2 = vector.load %arg1[%c32, %c0_3] : memref<40x512xf32, #tpu.memory_space<vmem>>, vector<1x64xf32>
    %cst = arith.constant dense<0.000000e+00> : vector<8x64xf32>
    %3 = tpu.matmul %0, %1, %cst {dimension_numbers = #tpu.dot_dimension_numbers<[1], [0], [0], [1], [0, 0, 1, 1], [], []>} : vector<8x16xf32>, vector<16x64xf32>, vector<8x64xf32> -> vector<8x64xf32>
    %4 = vector.broadcast %2 : vector<1x64xf32> to vector<8x64xf32>
    %5 = arith.addf %3, %4 : vector<8x64xf32>
    %6 = math.tanh %5 : vector<8x64xf32>
    %7 = vector.extract_strided_slice %6 {offsets = [0, 0], sizes = [8, 32], strides = [1, 1]} : vector<8x64xf32> to vector<8x32xf32>
    %8 = vector.extract_strided_slice %6 {offsets = [0, 32], sizes = [8, 32], strides = [1, 1]} : vector<8x64xf32> to vector<8x32xf32>
    %c0_4 = arith.constant 0 : index
    %c128 = arith.constant 128 : index
    %9 = vector.load %arg1[%c0_4, %c128] : memref<40x512xf32, #tpu.memory_space<vmem>>, vector<32x48xf32>
    %c32_5 = arith.constant 32 : index
    %c128_6 = arith.constant 128 : index
    %10 = vector.load %arg1[%c32_5, %c128_6] : memref<40x512xf32, #tpu.memory_space<vmem>>, vector<1x48xf32>
    %cst_7 = arith.constant dense<0.000000e+00> : vector<8x48xf32>
    %11 = tpu.matmul %7, %9, %cst_7 {dimension_numbers = #tpu.dot_dimension_numbers<[1], [0], [0], [1], [0, 0, 1, 1], [], []>} : vector<8x32xf32>, vector<32x48xf32>, vector<8x48xf32> -> vector<8x48xf32>
    %12 = vector.broadcast %10 : vector<1x48xf32> to vector<8x48xf32>
    %13 = arith.addf %11, %12 : vector<8x48xf32>
    %14 = vector.extract_strided_slice %13 {offsets = [0, 0], sizes = [8, 16], strides = [1, 1]} : vector<8x48xf32> to vector<8x16xf32>
    %15 = vector.extract_strided_slice %13 {offsets = [0, 16], sizes = [8, 32], strides = [1, 1]} : vector<8x48xf32> to vector<8x32xf32>
    %16 = math.tanh %15 : vector<8x32xf32>
    %c0_8 = arith.constant 0 : index
    %c256 = arith.constant 256 : index
    %17 = vector.load %arg1[%c0_8, %c256] : memref<40x512xf32, #tpu.memory_space<vmem>>, vector<32x256xf32>
    %c32_9 = arith.constant 32 : index
    %c256_10 = arith.constant 256 : index
    %18 = vector.load %arg1[%c32_9, %c256_10] : memref<40x512xf32, #tpu.memory_space<vmem>>, vector<1x256xf32>
    %cst_11 = arith.constant dense<0.000000e+00> : vector<8x256xf32>
    %19 = tpu.matmul %8, %17, %cst_11 {dimension_numbers = #tpu.dot_dimension_numbers<[1], [0], [0], [1], [0, 0, 1, 1], [], []>} : vector<8x32xf32>, vector<32x256xf32>, vector<8x256xf32> -> vector<8x256xf32>
    %20 = vector.broadcast %18 : vector<1x256xf32> to vector<8x256xf32>
    %21 = arith.addf %19, %20 : vector<8x256xf32>
    %cst_12 = arith.constant dense<0.000000e+00> : vector<8x256xf32>
    %22 = tpu.matmul %16, %17, %cst_12 {dimension_numbers = #tpu.dot_dimension_numbers<[1], [0], [0], [1], [0, 0, 1, 1], [], []>} : vector<8x32xf32>, vector<32x256xf32>, vector<8x256xf32> -> vector<8x256xf32>
    %23 = vector.broadcast %18 : vector<1x256xf32> to vector<8x256xf32>
    %24 = arith.addf %22, %23 : vector<8x256xf32>
    %25 = arith.mulf %21, %21 : vector<8x256xf32>
    %cst_13 = arith.constant dense<0.000000e+00> : vector<8xf32>
    %26 = vector.multi_reduction <add>, %25, %cst_13 [1] : vector<8x256xf32> to vector<8xf32>
    %27 = vector.shape_cast %26 : vector<8xf32> to vector<8x1xf32>
    %cst_14 = arith.constant dense<0.000000e+00> : vector<1xf32>
    %28 = vector.multi_reduction <add>, %27, %cst_14 [0] : vector<8x1xf32> to vector<1xf32>
    %29 = vector.shape_cast %28 : vector<1xf32> to vector<1x1xf32>
    %30 = arith.mulf %24, %24 : vector<8x256xf32>
    %cst_15 = arith.constant dense<0.000000e+00> : vector<8xf32>
    %31 = vector.multi_reduction <add>, %30, %cst_15 [1] : vector<8x256xf32> to vector<8xf32>
    %32 = vector.shape_cast %31 : vector<8xf32> to vector<8x1xf32>
    %cst_16 = arith.constant dense<0.000000e+00> : vector<1xf32>
    %33 = vector.multi_reduction <add>, %32, %cst_16 [0] : vector<8x1xf32> to vector<1xf32>
    %34 = vector.shape_cast %33 : vector<1xf32> to vector<1x1xf32>
    %c0_17 = arith.constant 0 : index
    %c0_18 = arith.constant 0 : index
    %35 = vector.load %arg2[%c0_17, %c0_18] : memref<10x16xf32, #tpu.memory_space<vmem>>, vector<8x16xf32>
    tpu.vector_store %arg2[%c0_17, %c0_18], %14 {strides = array<i32>} : memref<10x16xf32, #tpu.memory_space<vmem>>, vector<8x16xf32>,
    %36 = tpu.concatenate %29, %34 in 0 : vector<1x1xf32>, vector<1x1xf32> -> vector<2x1xf32>
    %37 = math.sqrt %36 : vector<2x1xf32>
    %c8 = arith.constant 8 : index
    %c0_19 = arith.constant 0 : index
    %38 = vector.load %arg2[%c8, %c0_19] : memref<10x16xf32, #tpu.memory_space<vmem>>, vector<2x1xf32>
    tpu.vector_store %arg2[%c8, %c0_19], %37 {strides = array<i32>} : memref<10x16xf32, #tpu.memory_space<vmem>>, vector<2x1xf32>,
    return
  }
}

</mosaic_0001>

<bundles_post_ra>
// kernel: base_geometric_flow_forward.1
= control target key start
LH: loop header
LB: loop body
LE: loop exit
PB: predicated region body
PF: predicated region fallthrough
CT: control target
= control target key end

     0   :  { %7 = vsyncpa [#allocation3], 0  ;;  %s592_s0 = inlined_call_operand.hbm [shape: f32[8,16], index: 0, kind: input, shape index: {}]   ;;  %s593_s1 = inlined_call_operand.hbm [shape: f32[40,512], index: 1, kind: input, shape index: {}]   ;;  %s594_s2 = inlined_call_operand.vmem [shape: f32[10,16], index: 2, kind: output, shape index: {}]  }
   0x1   :  { %8 = vsyncpa [#allocation5], 0  ;;  %s526_s9 = smov [#allocation2]   ;;  %s527_s11 = smov [#allocation4]  }
   0x2   :  { %s15_s10 = sshll.u32 %s526_s9, 4  ;;  %s24_s12 = sshll.u32 %s527_s11, 4  ;;  %s16_s10 = int_to_ptr.vmem [resolvable:$true] %s15_s10  ;;  %s550_s12 = int_to_ptr.vmem [resolvable:$true] %s24_s12 }
   0x3   :  { %s478_s15 = scalar_lea.hbm %s592_s0, 128 }
   0x4   :  { %p479_p0 = scmp.ne.s32.totalorder %s592_s0, %s478_s15  ;;  %p482_p1 = scmp.lt.u32.totalorder %s478_s15, %s592_s0 }
   0x6   :  { %p484_p2 = pnand %p482_p1, %p479_p0 }
   0x8   :  { %487 = shalt.err (!%p484_p2)
}
   0x9   :  { %s488_s20 = scalar_lea.vmem %s16_s10, 128  ;;  %p493_p4 = scmp.lt.s32.totalorder %s16_s10, %s16_s10 }
   0xa   :  { %p489_p3 = scmp.ne.s32.totalorder %s16_s10, %s488_s20  ;;  %p494_p5 = scmp.lt.s32.totalorder %s488_s20, %s488_s20 }
   0xc   :  { %p495_p6 = por %p494_p5, %p493_p4 }
   0xe   :  { %p496_p7 = pnand %p495_p6, %p489_p3 }
  0x10   :  { %499 = shalt.err (!%p496_p7)
}
  0x11   :  { %18 = dma.hbm_to_vmem [thread:$0]  %s592_s0, 128, %s16_s10, [#allocation3]  }
  0x12   :  { %s500_s25 = scalar_lea.hbm %s593_s1, 2560 }
  0x13   :  { %p501_p8 = scmp.ne.s32.totalorder %s593_s1, %s500_s25  ;;  %p504_p9 = scmp.lt.u32.totalorder %s500_s25, %s593_s1 }
  0x15   :  { %p506_p10 = pnand %p504_p9, %p501_p8 }
  0x17   :  { %509 = shalt.err (!%p506_p10)
}
  0x18   :  { %s510_s30 = scalar_lea.vmem %s550_s12, 2560  ;;  %p515_p12 = scmp.lt.s32.totalorder %s550_s12, %s550_s12 }
  0x19   :  { %p511_p11 = scmp.ne.s32.totalorder %s550_s12, %s510_s30  ;;  %p516_p13 = scmp.lt.s32.totalorder %s510_s30, %s510_s30 }
  0x1b   :  { %p517_p0 = por %p516_p13, %p515_p12 }
  0x1d   :  { %p518_p1 = pnand %p517_p0, %p511_p11 }
  0x1f   :  { %521 = shalt.err (!%p518_p1)
}
  0x20   :  { %s528_s0 = smov 512   ;;  %s529_s3 = smov 32  }
  0x21   :  { %30 = dma.hbm_to_vmem [thread:$0]  %s593_s1, 2560, %s550_s12, [#allocation5], %s528_s0, %s528_s0, %s529_s3  }
  0x22   :  { %522 = dma.done.wait [#allocation3], 128  }
  0x23   :  { %523 = vsyncadd [#allocation3], 4294967168 }
  0x24   :  { %524 = dma.done.wait [#allocation5], 2560  }
  0x25   :  { %525 = vsyncadd [#allocation5], 4294964736  ;;  %v530_v0 = vmov 0.0|0.0   ;;  %vm531_vm0 = vmmov 0   ;;  %v532_v1 = vmov 0.0   ;;  %v38_v2 = vld [vmem:[#allocation4] sm:$0xff]  ;;  %v207_v35 = vlaneseq }
  0x26   :  { %438 = vmatprep.subr.bf16.mxu0 %v530_v0  ;;  %424 = vmatprep.mubr.msk.f32.mxu0 %vm531_vm0, %v532_v1  ;;  %v39_v3 = vld [vmem:[#allocation4 + $0x20] sm:$0xff]  ;;  %v37_v5 = vld [vmem:[#allocation2] sm:$0xff]  ;;  %vm41_vm1 = vcmask 130048   ;;  %v116_v6 = vld [vmem:[#allocation4 + $0x8] sm:$0xff]  ;;  %vm121_vm2 = vcmask 261120   ;;  %s533_s1 = smov 96  }
  0x27   :  { %441 = vmatprep.subr.bf16.mxu1 %v530_v0  ;;  %435 = vmatprep.mubr.msk.f32.mxu1 %vm531_vm0, %v532_v1  ;;  %v439_v4 = vpack.c.bf16 %v39_v3, %v38_v2  ;;  %v117_v7 = vld [vmem:[#allocation4 + $0x28] sm:$0xff]  ;;  %v197_v12 = vld [vmem:[#allocation4 + $0x18] sm:$0xff]  ;;  %v196_v14 = vld [vmem:[#allocation4 + $0x10] sm:$0xff]  ;;  %s534_s8 = smov 112   ;;  %v208_v36 = vshrl.u32 %v207_v35, 7  ;;  %vm391_vm3 = vcmask 1040384  }
  0x28   :  { %v118_v8 = vld [vmem:[#allocation4 + $0x48] sm:$0xff]  ;;  %v442_v9 = vpack.c.bf16 %v117_v7, %v116_v6  ;;  %v199_v13 = vld [vmem:[#allocation4 + $0x38] sm:$0xff]  ;;  %v198_v16 = vld [vmem:[#allocation4 + $0x30] sm:$0xff]  ;;  %vm400_vm4 = vcmask 1024  }
  0x29   :  { %440 = vmatpush3.bf16.msra.mxu0 %v439_v4  ;;  %v119_v10 = vld [vmem:[#allocation4 + $0x68] sm:$0xff]  ;;  %v447_v15 = vpack.c.bf16 %v199_v13, %v197_v12  ;;  %v201_v17 = vld [vmem:[#allocation4 + $0x58] sm:$0xff]  ;;  %v449_v19 = vpack.c.bf16 %v198_v16, %v196_v14  ;;  %v200_v21 = vld [vmem:[#allocation4 + $0x50] sm:$0xff]  ;;  %v209_v37 = vsub.s32 0, %v208_v36  ;;  %v213_v39 = vsub.s32 1, %v208_v36 }
  0x2a   :  { %443 = vmatpush3.bf16.msra.mxu1 %v442_v9  ;;  %v445_v11 = vpack.c.bf16 %v119_v10, %v118_v8  ;;  %v203_v18 = vld [vmem:[#allocation4 + $0x78] sm:$0xff]  ;;  %v202_v22 = vld [vmem:[#allocation4 + $0x70] sm:$0xff]  ;;  %v40_v24 = vld [vmem:[#allocation4 + $0x80] ss:$0 sm:$0xff] }
  0x2b   :  { %444 = vmatprep.subr.bf16.mxu1 %v530_v0  ;;  %v451_v20 = vpack.c.bf16 %v203_v18, %v201_v17  ;;  %448 = vmatprep.subr.bf16.mxu0 %v447_v15  ;;  %v453_v23 = vpack.c.bf16 %v202_v22, %v200_v21  ;;  %v120_v30 = vld [vmem:[#allocation4 + $0x88] ss:$0 sm:$0xff]  ;;  %v205_v38 = vld [vmem:[#allocation4 + $0x90] ss:$8 sm:$0x3] }
  0x2c   :  { %425 = vmatmul.mubr.msk.f32.vlgmr.msra.gmra.mrb[0].mxu0 %vm41_vm1, %v37_v5  ;;  %v210_v40 = vrot.slane %v205_v38, %v209_v37  ;;  %v214_v41 = vrot.slane %v205_v38, %v213_v39 }
  0x2d   :  { %285 = vmatprep.mubr.f32.mxu0 %v532_v1  ;;  %450 = vmatpush1.bf16.msra.mxu0 %v449_v19 }
  0x2e   :  { %446 = vmatpush3.bf16.msra.mxu1 %v445_v11  ;;  %452 = vmatprep.subr.bf16.mxu0 %v451_v20 }
  0x2f   :  { %456 = vmatprep.subr.bf16.mxu1 %v447_v15 }
  0x31   :  { %454 = vmatpush1.bf16.msra.mxu0 %v453_v23 }
  0xff   :  { %v111_v25 = vpop.f32.mrb[0].mxu0 }
 0x100   :  { %v112_v26 = vadd.f32 %v111_v25, %v40_v24  ;;  %v426_v27 = vpop.f32.mrb[1].mxu0 }
 0x102   :  { %472 = vtanh.f32 %v112_v26 }
 0x10c   :  { %v473_v28 = vpop.eup %472 }
 0x10d   :  { %217 = vrot.lane.b32.xlu0 %v473_v28, %s533_s1  ;;  %436 = vmatmul.mubr.msk.f32.vlgmr.msra.gmra.mrb[0].mxu1 %vm121_vm2, %v473_v28 }
 0x10e   :  { %458 = vmatpush1.bf16.msra.mxu1 %v449_v19  ;;  %361 = vmatprep.mubr.f32.mxu1 %v532_v1 }
 0x10f   :  { %460 = vmatprep.subr.bf16.mxu1 %v451_v20 }
 0x112   :  { %462 = vmatpush1.bf16.msra.mxu1 %v453_v23 }
 0x17f   :  { %v218_v29 = vpop.permute.xlu0 %217 }
 0x180   :  { %410 = vmatmul.mubr.msk.f32.vlgmr.msra.gmra.mrb[2].mxu0 %vm121_vm2, %v218_v29 }
 0x1e0   :  { %v191_v31 = vpop.f32.mrb[0].mxu1 }
 0x1e1   :  { %v192_v32 = vadd.f32 %v191_v31, %v120_v30  ;;  %v437_v33 = vpop.f32.mrb[1].mxu1 }
 0x1e3   :  { %474 = vtanh.f32 %v192_v32  ;;  %390 = vst.msk [vmem:[%s594_s2] sm:$0xff] %vm41_vm1, %v192_v32 }
 0x1ed   :  { %v475_v34 = vpop.eup %474 }
 0x1ee   :  { %293 = vrot.lane.b32.xlu0 %v475_v34, %s534_s8 }
 0x253   :  { %v287_v42 = vpop.f32.mrb[2].mxu0 }
 0x254   :  { %v288_v43 = vadd.f32 %v287_v42, %v210_v40  ;;  %v289_v44 = vpop.f32.mrb[3].mxu0 }
 0x255   :  { %v290_v45 = vadd.f32 %v289_v44, %v214_v41 }
 0x256   :  { %v368_v46 = vmul.f32 %v288_v43, %v288_v43 }
 0x257   :  { %v369_v47 = vmul.f32 %v290_v45, %v290_v45 }
 0x259   :  { %v370_v48 = vadd.f32 %v369_v47, %v368_v46 }
 0x25b   :  { %371 = vadd.xlane.f32.xlu1 %v370_v48 }
 0x260   :  { %v294_v49 = vpop.permute.xlu0 %293 }
 0x261   :  { %411 = vmatmul.mubr.msk.f32.vlgmr.msra.gmra.mrb[2].mxu1 %vm121_vm2, %v294_v49 }
 0x2e8   :  { %v372_v57 = vpop.xlane.xlu1 %371 }
 0x2e9   :  { %v373_v58 = vrot.slane %v372_v57, 4 }
 0x2eb   :  { %v374_v59 = vadd.f32 %v373_v58, %v372_v57 }
 0x2ed   :  { %v375_v60 = vrot.slane %v374_v59, 2 }
 0x2ef   :  { %v376_v63 = vadd.f32 %v375_v60, %v374_v59 }
 0x2f1   :  { %v377_v2 = vrot.slane %v376_v63, 1 }
 0x2f3   :  { %v378_v5 = vadd.f32 %v377_v2, %v376_v63 }
 0x334   :  { %v363_v50 = vpop.f32.mrb[2].mxu1 }
 0x335   :  { %v364_v51 = vadd.f32 %v363_v50, %v210_v40  ;;  %v365_v52 = vpop.f32.mrb[3].mxu1 }
 0x336   :  { %v366_v53 = vadd.f32 %v365_v52, %v214_v41 }
 0x337   :  { %v379_v54 = vmul.f32 %v364_v51, %v364_v51 }
 0x338   :  { %v380_v55 = vmul.f32 %v366_v53, %v366_v53 }
 0x33a   :  { %v381_v56 = vadd.f32 %v380_v55, %v379_v54 }
 0x33c   :  { %382 = vadd.xlane.f32.xlu1 %v381_v56 }
 0x3c9   :  { %v383_v61 = vpop.xlane.xlu1 %382 }
 0x3ca   :  { %v384_v62 = vrot.slane %v383_v61, 4 }
 0x3cc   :  { %v385_v0 = vadd.f32 %v384_v62, %v383_v61 }
 0x3ce   :  { %v386_v1 = vrot.slane %v385_v0, 2 }
 0x3d0   :  { %v387_v3 = vadd.f32 %v386_v1, %v385_v0 }
 0x3d2   :  { %v388_v4 = vrot.slane %v387_v3, 1 }
 0x3d4   :  { %v389_v6 = vadd.f32 %v388_v4, %v387_v3 }
 0x3d6   :  { %v392_v7 = vsel %vm391_vm3, %v378_v5, %v389_v6 }
 0x3d7   :  { %476 = vrsqrt.f32 %v392_v7  ;;  %vm395_vm5 = vcmp.eq.f32.partialorder %v392_v7, inf  ;;  %v398_v10 = vand.u32 2147483648, %v392_v7  ;;  %vm397_vm6 = vcmp.eq.f32.partialorder %v392_v7, 0.0 }
 0x3e1   :  { %v477_v8 = vpop.eup %476 }
 0x3e2   :  { %v394_v9 = vmul.f32 %v477_v8, %v392_v7 }
 0x3e4   :  { %v396_v11 = vsel %vm395_vm5, %v392_v7, %v394_v9 }
 0x3e5   :  { %v399_v12 = vsel %vm397_vm6, %v398_v10, %v396_v11 }
 0x3e6   :  { %401 = vst.msk [vmem:[%s594_s2 + $0x8] sm:$0x3] %vm400_vm4, %v399_v12 }
 0x3e7   :  { %406 = vsyncpa [#allocation3], 1 }
 0x3e8   :  { %407 = vsyncpa [#allocation5], 1 }

</bundles_post_ra>
